<compile_context>
chip_gen: v5e
topology: v5e:2x2
jax: 0.10.0
libtpu: 0.0.40
codegen_flags: <defaults>
</compile_context>

<pallas_src>
import functools

import jax
import jax.numpy as jnp
from jax import lax
from jax.experimental import pallas as pl
from jax.experimental.pallas import tpu as pltpu

HIDDEN_DIM = 8
NT_DEVICE, NT_IP, NT_USER, NT_NOTE, NT_EVENT = 0, 1, 2, 3, 4
_TYPE_ORDER = ("device", "ip", "user", "note", "event")
_TYPE_IDS = (NT_DEVICE, NT_IP, NT_USER, NT_NOTE, NT_EVENT)

# bf16 packs 2 rows / sublane; align per-type row blocks to a full packed tile
# so every static in-kernel slice is tile-aligned (no relayout copies).
_ROW_ALIGN = 16


def _round_up(n, m):
    return (n + m - 1) // m * m


# ------------------------------ fused kernel -------------------------------

def _fused_kernel(nid_ref, x_ref, w_ref, b_ref, o_ref, y_ref, *,
                  pad_rows, real_rows):
    """Fused: 5 per-node-type Linears (+ folded bias) and the row scatter.

    x_ref : (sum pad_rows, K_max) bf16, per-type row blocks, data columns only
    w_ref : (5, K_max, H)         bf16, per-type weights (zero rows for pad)
    b_ref : (5, H)                f32,  effective bias (bias + node-type-embed)
    nid_ref: (N_real,)            i32 in SMEM, destination row per real row
    o_ref : (N_out, H)            f32
    y_ref : (sum pad_rows, H)     f32 scratch holding the per-type Linears
    """
    # ---- 5 per-type matmuls on statically sliced, aligned row blocks -------
    off = 0
    for t, rows in enumerate(pad_rows):
        xb = x_ref[pl.ds(off, rows), :]                           # (rows, K) bf16
        yb = jnp.dot(xb, w_ref[t], preferred_element_type=jnp.float32)
        y_ref[pl.ds(off, rows), :] = yb + b_ref[pl.ds(t, 1), :]   # + (1, H) f32
        off += rows

    # ---- O(N) scatter: output[node_id[i]] = y[i]; untouched rows stay 0 ----
    o_ref[...] = jnp.zeros_like(o_ref)

    def scatter_block(nid_base, y_base, count):
        def body(r, carry):
            j = nid_ref[nid_base + r]                 # SMEM scalar read
            o_ref[pl.ds(j, 1), :] = y_ref[pl.ds(y_base + r, 1), :]
            return carry
        lax.fori_loop(0, count, body, 0)              # sequential => last write wins

    nid_off = 0
    pad_off = 0
    for rows_real, rows_pad in zip(real_rows, pad_rows):
        scatter_block(nid_off, pad_off, rows_real)
        nid_off += rows_real
        pad_off += rows_pad


def fused_forward(x, w_stack, b_eff, node_id, *, n_out, pad_rows, real_rows):
    h = w_stack.shape[-1]
    n_pad_total = x.shape[0]
    kernel = functools.partial(_fused_kernel, pad_rows=tuple(pad_rows),
                               real_rows=tuple(real_rows))
    vmem = pl.BlockSpec(memory_space=pltpu.MemorySpace.VMEM)
    smem = pl.BlockSpec(memory_space=pltpu.MemorySpace.SMEM)
    return pl.pallas_call(
        kernel,
        out_shape=jax.ShapeDtypeStruct((n_out, h), jnp.float32),
        in_specs=[smem, vmem, vmem, vmem],
        out_specs=vmem,
        scratch_shapes=[pltpu.VMEM((n_pad_total, h), jnp.float32)],
    )(node_id.astype(jnp.int32), x, w_stack, b_eff)


# ------------------------- NodeInputLayer (params) --------------------------

def init_node_layer(key, embed_dims=(), cate_nums=(), num_dense=0,
                    use_node_type=True, hidden_dim=HIDDEN_DIM):
    keys = jax.random.split(key, len(embed_dims) + 2)
    tables = [
        0.02 * jax.random.normal(keys[i], (c, d), jnp.float32)
        for i, (d, c) in enumerate(zip(embed_dims, cate_nums))
    ]
    feat_dim = sum(embed_dims) + num_dense + (hidden_dim if use_node_type else 0)
    w = 0.1 * jax.random.normal(keys[-2], (feat_dim, hidden_dim), jnp.float32)
    b = 0.01 * jax.random.normal(keys[-1], (hidden_dim,), jnp.float32)
    return {"tables": tables, "w": w, "b": b, "use_node_type": use_node_type}


def prepare_packed_params(params):
    """Hoisted, per-model packing (do NOT rebuild every forward).

    * Splits each node type's W into data columns vs node-type-embedding
      columns; the node-type part is a per-type constant and is folded into an
      effective bias b_eff[t] = b_t + nt[t] @ W_nt_t.
    * Pads data weights to a common K_max and stacks to (5, K_max, H) bf16.
    """
    nt = params["node_type_table"]
    h = nt.shape[1]

    k_data = []
    for name in _TYPE_ORDER:
        p = params[name]
        k_data.append(p["w"].shape[0] - (h if p["use_node_type"] else 0))
    k_max = max(max(k_data), 1)

    w_rows, b_rows = [], []
    for name, ntid, kd in zip(_TYPE_ORDER, _TYPE_IDS, k_data):
        p = params[name]
        w, b = p["w"], p["b"]
        w_data = w[:kd]                                   # (kd, H)
        if p["use_node_type"]:
            b = b + nt[ntid] @ w[kd:]                     # fold constant embed
        w_rows.append(jnp.pad(w_data, ((0, k_max - kd), (0, 0))))
        b_rows.append(b)

    return {
        "w_stack": jnp.stack(w_rows).astype(jnp.bfloat16),   # (5, K_max, H)
        "b_eff": jnp.stack(b_rows).astype(jnp.float32),      # (5, H)
        "k_max": k_max,
        "hidden": h,
    }


# -------------------------- RedBookInputLayer fwd ---------------------------

def redbook_input_layer_forward(params, packed, device_df, ip_df, note_df,
                                user_df, event_df):
    k_max = packed["k_max"]

    # --- per-type DATA features only (node-type embed / bias already folded) -
    def device_feats():
        p = params["device"]
        brand = jnp.take(p["tables"][0],
                         device_df["device_brand"].astype(jnp.int32), axis=0)
        osf = jnp.take(p["tables"][1],
                       device_df["device_os"].astype(jnp.int32), axis=0)
        return jnp.concatenate([brand, osf], axis=1)          # (n_d, 8)

    def user_feats():
        return jnp.stack([user_df["has_behavior"],
                          user_df["is_followed"]], axis=1).astype(jnp.float32)

    def event_feats():
        p = params["event"]
        return jnp.take(p["tables"][0],
                        event_df["event_type"].astype(jnp.int32), axis=0)

    node_ids = [device_df["device_id_node_id"], ip_df["user_ipaddress_node_id"],
                user_df["user_node_id"], note_df["note_node_id"],
                event_df["event_id_node_id"]]
    real_rows = [int(nid.shape[0]) for nid in node_ids]

    feats = [device_feats(),
             None,                      # ip: no data features
             user_feats(),
             None,                      # note: no data features
             event_feats()]

    pad_rows, x_blocks = [], []
    for n, f in zip(real_rows, feats):
        n_pad = max(_round_up(n, _ROW_ALIGN), _ROW_ALIGN)
        pad_rows.append(n_pad)
        if f is None or f.shape[1] == 0:
            x_blocks.append(jnp.zeros((n_pad, k_max), jnp.float32))
        else:
            kd = f.shape[1]
            x_blocks.append(jnp.pad(f, ((0, n_pad - n), (0, k_max - kd))))

    x = jnp.concatenate(x_blocks, axis=0).astype(jnp.bfloat16)   # (sum pad, K_max)
    node_id = jnp.concatenate(node_ids).astype(jnp.int32)        # (N,)
    n_out = int(node_id.shape[0])
    # NOTE: node_id values must lie in [0, n_out); OOB ids would be an OOB
    # store in the kernel (torch would raise).  The test uses a permutation.
    return fused_forward(x, packed["w_stack"], packed["b_eff"], node_id,
                         n_out=n_out, pad_rows=pad_rows, real_rows=real_rows)


# ----------------------- pure-JAX reference (testing) -----------------------

def _reference_forward(params, device_df, ip_df, note_df, user_df, event_df):
    nt = params["node_type_table"]

    def lin(x, p):
        return x @ p["w"] + p["b"]

    def feats(p, ntid, n_rows, cat_ids=(), dense=None):
        fs = [jnp.take(t, i.astype(jnp.int32), axis=0)
              for t, i in zip(p["tables"], cat_ids)]
        if dense is not None:
            fs.append(dense.astype(jnp.float32))
        if p["use_node_type"]:
            fs.append(jnp.broadcast_to(nt[ntid], (n_rows, nt.shape[1])))
        return jnp.concatenate(fs, axis=1)

    x_device = lin(feats(params["device"], NT_DEVICE,
                         device_df["device_id_node_id"].shape[0],
                         (device_df["device_brand"], device_df["device_os"])),
                   params["device"])
    x_ip = lin(feats(params["ip"], NT_IP,
                     ip_df["user_ipaddress_node_id"].shape[0]), params["ip"])
    x_user = lin(feats(params["user"], NT_USER, user_df["user_node_id"].shape[0],
                       dense=jnp.stack([user_df["has_behavior"],
                                        user_df["is_followed"]], axis=1)),
                 params["user"])
    x_note = lin(feats(params["note"], NT_NOTE,
                       note_df["note_node_id"].shape[0]), params["note"])
    x_event = lin(feats(params["event"], NT_EVENT,
                        event_df["event_id_node_id"].shape[0],
                        (event_df["event_type"],)), params["event"])
    X = jnp.concatenate([x_device, x_ip, x_user, x_note, x_event], axis=0)
    node_id = jnp.concatenate([
        device_df["device_id_node_id"], ip_df["user_ipaddress_node_id"],
        user_df["user_node_id"], note_df["note_node_id"],
        event_df["event_id_node_id"]]).astype(jnp.int32)
    return jnp.zeros_like(X).at[node_id].set(X)


if __name__ == "__main__":
    key = jax.random.PRNGKey(0)
    keys = jax.random.split(key, 12)

    # configs analogous to the torch module args: (col_name, embed_dim, cate_num)
    # device_cfg = [("device_brand", 4, 10), ("device_os", 4, 6)]
    # event_cfg  = [("event_type", 4, 7)]
    hidden_dim = HIDDEN_DIM
    n_device = n_ip = n_user = n_note = n_event = 4
    n_total = n_device + n_ip + n_user + n_note + n_event

    params = {
        "node_type_table": 0.02 * jax.random.normal(keys[0], (5, hidden_dim), jnp.float32),
        "device": init_node_layer(keys[1], embed_dims=[4, 4], cate_nums=[10, 6]),
        "ip": init_node_layer(keys[2]),
        "user": init_node_layer(keys[3], num_dense=2, use_node_type=False),
        "note": init_node_layer(keys[4]),
        "event": init_node_layer(keys[5], embed_dims=[4], cate_nums=[7]),
    }
    packed = prepare_packed_params(params)   # hoisted out of the forward path

    # synthetic "dataframes": node ids form a compact permutation of [0, N)
    node_id = jax.random.permutation(keys[6], jnp.arange(n_total, dtype=jnp.int32))
    device_df = {
        "device_id_node_id": node_id[0:4],
        "device_brand": jax.random.randint(keys[7], (n_device,), 0, 10),
        "device_os": jax.random.randint(keys[8], (n_device,), 0, 6),
    }
    ip_df = {"user_ipaddress_node_id": node_id[4:8]}
    user_df = {
        "user_node_id": node_id[8:12],
        "has_behavior": jax.random.bernoulli(keys[9], 0.5, (n_user,)).astype(jnp.float32),
        "is_followed": jax.random.bernoulli(keys[10], 0.5, (n_user,)).astype(jnp.float32),
    }
    note_df = {"note_node_id": node_id[12:16]}
    event_df = {
        "event_id_node_id": node_id[16:20],
        "event_type": jax.random.randint(keys[11], (n_event,), 0, 7),
    }

    out = redbook_input_layer_forward(params, packed, device_df, ip_df,
                                      note_df, user_df, event_df)
    out = jax.block_until_ready(out)

    ref = _reference_forward(params, device_df, ip_df, note_df, user_df, event_df)
    assert out.shape == (n_total, hidden_dim), out.shape
    # tolerance loosened for the bf16 x / W path (accumulation is f32)
    assert jnp.allclose(out, ref, atol=1e-2, rtol=1e-2), "mismatch vs reference"

    print("KERNEL_OK")
</pallas_src>

<mosaic_0001>
module attributes {stable_mosaic.version = 11 : i64} {
  func.func @_fused_kernel(%arg0: memref<20xi32, #tpu.memory_space<smem>>, %arg1: memref<80x8xbf16, #tpu.memory_space<vmem>>, %arg2: memref<5x8x8xbf16, #tpu.memory_space<vmem>>, %arg3: memref<5x8xf32, #tpu.memory_space<vmem>>, %arg4: memref<20x8xf32, #tpu.memory_space<vmem>>, %arg5: memref<80x8xf32, #tpu.memory_space<vmem>>) attributes {dimension_semantics = [], scalar_prefetch = 0 : i64, scratch_operands = 1 : i64, tpu.core_type = #tpu.core_type<tc>} {
    %c0 = arith.constant 0 : index
    %c0_0 = arith.constant 0 : index
    %0 = vector.load %arg1[%c0, %c0_0] : memref<80x8xbf16, #tpu.memory_space<vmem>>, vector<16x8xbf16>
    %c0_1 = arith.constant 0 : index
    %c0_2 = arith.constant 0 : index
    %c0_3 = arith.constant 0 : index
    %1 = vector.load %arg2[%c0_1, %c0_2, %c0_3] : memref<5x8x8xbf16, #tpu.memory_space<vmem>>, vector<1x8x8xbf16>
    %2 = vector.shape_cast %1 : vector<1x8x8xbf16> to vector<8x8xbf16>
    %cst = arith.constant dense<0.000000e+00> : vector<16x8xf32>
    %3 = tpu.matmul %0, %2, %cst {dimension_numbers = #tpu.dot_dimension_numbers<[1], [0], [0], [1], [0, 0, 1, 1], [], []>} : vector<16x8xbf16>, vector<8x8xbf16>, vector<16x8xf32> -> vector<16x8xf32>
    %c0_4 = arith.constant 0 : index
    %c0_5 = arith.constant 0 : index
    %4 = vector.load %arg3[%c0_4, %c0_5] : memref<5x8xf32, #tpu.memory_space<vmem>>, vector<1x8xf32>
    %5 = vector.broadcast %4 : vector<1x8xf32> to vector<16x8xf32>
    %6 = arith.addf %3, %5 : vector<16x8xf32>
    %c0_6 = arith.constant 0 : index
    %c0_7 = arith.constant 0 : index
    %7 = vector.load %arg5[%c0_6, %c0_7] : memref<80x8xf32, #tpu.memory_space<vmem>>, vector<16x8xf32>
    tpu.vector_store %arg5[%c0_6, %c0_7], %6 {strides = array<i32>} : memref<80x8xf32, #tpu.memory_space<vmem>>, vector<16x8xf32>,
    %c16 = arith.constant 16 : index
    %c0_8 = arith.constant 0 : index
    %8 = vector.load %arg1[%c16, %c0_8] : memref<80x8xbf16, #tpu.memory_space<vmem>>, vector<16x8xbf16>
    %c1 = arith.constant 1 : index
    %c0_9 = arith.constant 0 : index
    %c0_10 = arith.constant 0 : index
    %9 = vector.load %arg2[%c1, %c0_9, %c0_10] : memref<5x8x8xbf16, #tpu.memory_space<vmem>>, vector<1x8x8xbf16>
    %10 = vector.shape_cast %9 : vector<1x8x8xbf16> to vector<8x8xbf16>
    %cst_11 = arith.constant dense<0.000000e+00> : vector<16x8xf32>
    %11 = tpu.matmul %8, %10, %cst_11 {dimension_numbers = #tpu.dot_dimension_numbers<[1], [0], [0], [1], [0, 0, 1, 1], [], []>} : vector<16x8xbf16>, vector<8x8xbf16>, vector<16x8xf32> -> vector<16x8xf32>
    %c1_12 = arith.constant 1 : index
    %c0_13 = arith.constant 0 : index
    %12 = vector.load %arg3[%c1_12, %c0_13] : memref<5x8xf32, #tpu.memory_space<vmem>>, vector<1x8xf32>
    %13 = vector.broadcast %12 : vector<1x8xf32> to vector<16x8xf32>
    %14 = arith.addf %11, %13 : vector<16x8xf32>
    %c16_14 = arith.constant 16 : index
    %c0_15 = arith.constant 0 : index
    %15 = vector.load %arg5[%c16_14, %c0_15] : memref<80x8xf32, #tpu.memory_space<vmem>>, vector<16x8xf32>
    tpu.vector_store %arg5[%c16_14, %c0_15], %14 {strides = array<i32>} : memref<80x8xf32, #tpu.memory_space<vmem>>, vector<16x8xf32>,
    %c32 = arith.constant 32 : index
    %c0_16 = arith.constant 0 : index
    %16 = vector.load %arg1[%c32, %c0_16] : memref<80x8xbf16, #tpu.memory_space<vmem>>, vector<16x8xbf16>
    %c2 = arith.constant 2 : index
    %c0_17 = arith.constant 0 : index
    %c0_18 = arith.constant 0 : index
    %17 = vector.load %arg2[%c2, %c0_17, %c0_18] : memref<5x8x8xbf16, #tpu.memory_space<vmem>>, vector<1x8x8xbf16>
    %18 = vector.shape_cast %17 : vector<1x8x8xbf16> to vector<8x8xbf16>
    %cst_19 = arith.constant dense<0.000000e+00> : vector<16x8xf32>
    %19 = tpu.matmul %16, %18, %cst_19 {dimension_numbers = #tpu.dot_dimension_numbers<[1], [0], [0], [1], [0, 0, 1, 1], [], []>} : vector<16x8xbf16>, vector<8x8xbf16>, vector<16x8xf32> -> vector<16x8xf32>
    %c2_20 = arith.constant 2 : index
    %c0_21 = arith.constant 0 : index
    %20 = vector.load %arg3[%c2_20, %c0_21] : memref<5x8xf32, #tpu.memory_space<vmem>>, vector<1x8xf32>
    %21 = vector.broadcast %20 : vector<1x8xf32> to vector<16x8xf32>
    %22 = arith.addf %19, %21 : vector<16x8xf32>
    %c32_22 = arith.constant 32 : index
    %c0_23 = arith.constant 0 : index
    %23 = vector.load %arg5[%c32_22, %c0_23] : memref<80x8xf32, #tpu.memory_space<vmem>>, vector<16x8xf32>
    tpu.vector_store %arg5[%c32_22, %c0_23], %22 {strides = array<i32>} : memref<80x8xf32, #tpu.memory_space<vmem>>, vector<16x8xf32>,
    %c48 = arith.constant 48 : index
    %c0_24 = arith.constant 0 : index
    %24 = vector.load %arg1[%c48, %c0_24] : memref<80x8xbf16, #tpu.memory_space<vmem>>, vector<16x8xbf16>
    %c3 = arith.constant 3 : index
    %c0_25 = arith.constant 0 : index
    %c0_26 = arith.constant 0 : index
    %25 = vector.load %arg2[%c3, %c0_25, %c0_26] : memref<5x8x8xbf16, #tpu.memory_space<vmem>>, vector<1x8x8xbf16>
    %26 = vector.shape_cast %25 : vector<1x8x8xbf16> to vector<8x8xbf16>
    %cst_27 = arith.constant dense<0.000000e+00> : vector<16x8xf32>
    %27 = tpu.matmul %24, %26, %cst_27 {dimension_numbers = #tpu.dot_dimension_numbers<[1], [0], [0], [1], [0, 0, 1, 1], [], []>} : vector<16x8xbf16>, vector<8x8xbf16>, vector<16x8xf32> -> vector<16x8xf32>
    %c3_28 = arith.constant 3 : index
    %c0_29 = arith.constant 0 : index
    %28 = vector.load %arg3[%c3_28, %c0_29] : memref<5x8xf32, #tpu.memory_space<vmem>>, vector<1x8xf32>
    %29 = vector.broadcast %28 : vector<1x8xf32> to vector<16x8xf32>
    %30 = arith.addf %27, %29 : vector<16x8xf32>
    %c48_30 = arith.constant 48 : index
    %c0_31 = arith.constant 0 : index
    %31 = vector.load %arg5[%c48_30, %c0_31] : memref<80x8xf32, #tpu.memory_space<vmem>>, vector<16x8xf32>
    tpu.vector_store %arg5[%c48_30, %c0_31], %30 {strides = array<i32>} : memref<80x8xf32, #tpu.memory_space<vmem>>, vector<16x8xf32>,
    %c64 = arith.constant 64 : index
    %c0_32 = arith.constant 0 : index
    %32 = vector.load %arg1[%c64, %c0_32] : memref<80x8xbf16, #tpu.memory_space<vmem>>, vector<16x8xbf16>
    %c4 = arith.constant 4 : index
    %c0_33 = arith.constant 0 : index
    %c0_34 = arith.constant 0 : index
    %33 = vector.load %arg2[%c4, %c0_33, %c0_34] : memref<5x8x8xbf16, #tpu.memory_space<vmem>>, vector<1x8x8xbf16>
    %34 = vector.shape_cast %33 : vector<1x8x8xbf16> to vector<8x8xbf16>
    %cst_35 = arith.constant dense<0.000000e+00> : vector<16x8xf32>
    %35 = tpu.matmul %32, %34, %cst_35 {dimension_numbers = #tpu.dot_dimension_numbers<[1], [0], [0], [1], [0, 0, 1, 1], [], []>} : vector<16x8xbf16>, vector<8x8xbf16>, vector<16x8xf32> -> vector<16x8xf32>
    %c4_36 = arith.constant 4 : index
    %c0_37 = arith.constant 0 : index
    %36 = vector.load %arg3[%c4_36, %c0_37] : memref<5x8xf32, #tpu.memory_space<vmem>>, vector<1x8xf32>
    %37 = vector.broadcast %36 : vector<1x8xf32> to vector<16x8xf32>
    %38 = arith.addf %35, %37 : vector<16x8xf32>
    %c64_38 = arith.constant 64 : index
    %c0_39 = arith.constant 0 : index
    %39 = vector.load %arg5[%c64_38, %c0_39] : memref<80x8xf32, #tpu.memory_space<vmem>>, vector<16x8xf32>
    tpu.vector_store %arg5[%c64_38, %c0_39], %38 {strides = array<i32>} : memref<80x8xf32, #tpu.memory_space<vmem>>, vector<16x8xf32>,
    %cst_40 = arith.constant 0.000000e+00 : f32
    %40 = vector.broadcast %cst_40 : f32 to vector<20x8xf32>
    %c0_41 = arith.constant 0 : index
    %c0_42 = arith.constant 0 : index
    %41 = vector.load %arg4[%c0_41, %c0_42] : memref<20x8xf32, #tpu.memory_space<vmem>>, vector<20x8xf32>
    tpu.vector_store %arg4[%c0_41, %c0_42], %40 {strides = array<i32>} : memref<20x8xf32, #tpu.memory_space<vmem>>, vector<20x8xf32>,
    %c0_i32 = arith.constant 0 : i32
    %c4_i32 = arith.constant 4 : i32
    %42 = arith.addi %c0_i32, %c4_i32 : i32
    %c1_i32 = arith.constant 1 : i32
    scf.for %arg6 = %c0_i32 to %42 step %c1_i32  : i32 {
      %c0_i32_60 = arith.constant 0 : i32
      %47 = arith.addi %c0_i32_60, %arg6 : i32
      %48 = arith.index_cast %47 : i32 to index
      %49 = memref.load %arg0[%48] : memref<20xi32, #tpu.memory_space<smem>>
      %c0_i32_61 = arith.constant 0 : i32
      %50 = arith.addi %c0_i32_61, %arg6 : i32
      %51 = arith.index_cast %50 : i32 to index
      %c0_62 = arith.constant 0 : index
      %52 = vector.load %arg5[%51, %c0_62] : memref<80x8xf32, #tpu.memory_space<vmem>>, vector<1x8xf32>
      %53 = arith.index_cast %49 : i32 to index
      %c0_63 = arith.constant 0 : index
      %54 = vector.load %arg4[%53, %c0_63] : memref<20x8xf32, #tpu.memory_space<vmem>>, vector<1x8xf32>
      tpu.vector_store %arg4[%53, %c0_63], %52 {strides = array<i32>} : memref<20x8xf32, #tpu.memory_space<vmem>>, vector<1x8xf32>,
    }
    %c4_i32_43 = arith.constant 4 : i32
    %c0_i32_44 = arith.constant 0 : i32
    %c4_i32_45 = arith.constant 4 : i32
    %43 = arith.addi %c0_i32_44, %c4_i32_45 : i32
    %c1_i32_46 = arith.constant 1 : i32
    scf.for %arg6 = %c0_i32_44 to %43 step %c1_i32_46  : i32 {
      %c4_i32_60 = arith.constant 4 : i32
      %47 = arith.addi %c4_i32_60, %arg6 : i32
      %48 = arith.index_cast %47 : i32 to index
      %49 = memref.load %arg0[%48] : memref<20xi32, #tpu.memory_space<smem>>
      %c16_i32 = arith.constant 16 : i32
      %50 = arith.addi %c16_i32, %arg6 : i32
      %51 = arith.index_cast %50 : i32 to index
      %c0_61 = arith.constant 0 : index
      %52 = vector.load %arg5[%51, %c0_61] : memref<80x8xf32, #tpu.memory_space<vmem>>, vector<1x8xf32>
      %53 = arith.index_cast %49 : i32 to index
      %c0_62 = arith.constant 0 : index
      %54 = vector.load %arg4[%53, %c0_62] : memref<20x8xf32, #tpu.memory_space<vmem>>, vector<1x8xf32>
      tpu.vector_store %arg4[%53, %c0_62], %52 {strides = array<i32>} : memref<20x8xf32, #tpu.memory_space<vmem>>, vector<1x8xf32>,
    }
    %c4_i32_47 = arith.constant 4 : i32
    %c0_i32_48 = arith.constant 0 : i32
    %c4_i32_49 = arith.constant 4 : i32
    %44 = arith.addi %c0_i32_48, %c4_i32_49 : i32
    %c1_i32_50 = arith.constant 1 : i32
    scf.for %arg6 = %c0_i32_48 to %44 step %c1_i32_50  : i32 {
      %c8_i32 = arith.constant 8 : i32
      %47 = arith.addi %c8_i32, %arg6 : i32
      %48 = arith.index_cast %47 : i32 to index
      %49 = memref.load %arg0[%48] : memref<20xi32, #tpu.memory_space<smem>>
      %c32_i32 = arith.constant 32 : i32
      %50 = arith.addi %c32_i32, %arg6 : i32
      %51 = arith.index_cast %50 : i32 to index
      %c0_60 = arith.constant 0 : index
      %52 = vector.load %arg5[%51, %c0_60] : memref<80x8xf32, #tpu.memory_space<vmem>>, vector<1x8xf32>
      %53 = arith.index_cast %49 : i32 to index
      %c0_61 = arith.constant 0 : index
      %54 = vector.load %arg4[%53, %c0_61] : memref<20x8xf32, #tpu.memory_space<vmem>>, vector<1x8xf32>
      tpu.vector_store %arg4[%53, %c0_61], %52 {strides = array<i32>} : memref<20x8xf32, #tpu.memory_space<vmem>>, vector<1x8xf32>,
    }
    %c4_i32_51 = arith.constant 4 : i32
    %c0_i32_52 = arith.constant 0 : i32
    %c4_i32_53 = arith.constant 4 : i32
    %45 = arith.addi %c0_i32_52, %c4_i32_53 : i32
    %c1_i32_54 = arith.constant 1 : i32
    scf.for %arg6 = %c0_i32_52 to %45 step %c1_i32_54  : i32 {
      %c12_i32 = arith.constant 12 : i32
      %47 = arith.addi %c12_i32, %arg6 : i32
      %48 = arith.index_cast %47 : i32 to index
      %49 = memref.load %arg0[%48] : memref<20xi32, #tpu.memory_space<smem>>
      %c48_i32 = arith.constant 48 : i32
      %50 = arith.addi %c48_i32, %arg6 : i32
      %51 = arith.index_cast %50 : i32 to index
      %c0_60 = arith.constant 0 : index
      %52 = vector.load %arg5[%51, %c0_60] : memref<80x8xf32, #tpu.memory_space<vmem>>, vector<1x8xf32>
      %53 = arith.index_cast %49 : i32 to index
      %c0_61 = arith.constant 0 : index
      %54 = vector.load %arg4[%53, %c0_61] : memref<20x8xf32, #tpu.memory_space<vmem>>, vector<1x8xf32>
      tpu.vector_store %arg4[%53, %c0_61], %52 {strides = array<i32>} : memref<20x8xf32, #tpu.memory_space<vmem>>, vector<1x8xf32>,
    }
    %c4_i32_55 = arith.constant 4 : i32
    %c0_i32_56 = arith.constant 0 : i32
    %c4_i32_57 = arith.constant 4 : i32
    %46 = arith.addi %c0_i32_56, %c4_i32_57 : i32
    %c1_i32_58 = arith.constant 1 : i32
    scf.for %arg6 = %c0_i32_56 to %46 step %c1_i32_58  : i32 {
      %c16_i32 = arith.constant 16 : i32
      %47 = arith.addi %c16_i32, %arg6 : i32
      %48 = arith.index_cast %47 : i32 to index
      %49 = memref.load %arg0[%48] : memref<20xi32, #tpu.memory_space<smem>>
      %c64_i32 = arith.constant 64 : i32
      %50 = arith.addi %c64_i32, %arg6 : i32
      %51 = arith.index_cast %50 : i32 to index
      %c0_60 = arith.constant 0 : index
      %52 = vector.load %arg5[%51, %c0_60] : memref<80x8xf32, #tpu.memory_space<vmem>>, vector<1x8xf32>
      %53 = arith.index_cast %49 : i32 to index
      %c0_61 = arith.constant 0 : index
      %54 = vector.load %arg4[%53, %c0_61] : memref<20x8xf32, #tpu.memory_space<vmem>>, vector<1x8xf32>
      tpu.vector_store %arg4[%53, %c0_61], %52 {strides = array<i32>} : memref<20x8xf32, #tpu.memory_space<vmem>>, vector<1x8xf32>,
    }
    %c4_i32_59 = arith.constant 4 : i32
    return
  }
}

</mosaic_0001>

<bundles_post_ra>
// kernel: tpu_custom_call.1
= control target key start
LH: loop header
LB: loop body
LE: loop exit
PB: predicated region body
PF: predicated region fallthrough
CT: control target
= control target key end

     0   :  { %9 = vsyncpa [#allocation4], 0  ;;  %s452_s18 = smov [#allocation3]   ;;  %s578_s0 = inlined_call_operand.vmem [shape: s32[20], index: 0, kind: input, shape index: {}]   ;;  %s579_s1 = inlined_call_operand.vmem [shape: bf16[80,8], index: 1, kind: input, shape index: {}]   ;;  %s580_s2 = inlined_call_operand.vmem [shape: bf16[5,8,8], index: 2, kind: input, shape index: {}]   ;;  %s581_s3 = inlined_call_operand.vmem [shape: f32[5,8], index: 3, kind: input, shape index: {}]   ;;  %s582_s4 = inlined_call_operand.vmem [shape: f32[20,8], index: 4, kind: output, shape index: {}]  }
   0x1   :  { %s15_s17 = sshll.u32 %s578_s0, 4  ;;  %s16_s17 = int_to_ptr.vmem [resolvable:$true] %s15_s17 }
   0x2   :  { %18 = dma.vmem_to_smem %s16_s17, 16, %s452_s18, [#allocation4]  }
   0x3   :  { %430 = dma.done.wait [#allocation4], 16  }
   0x4   :  { %431 = vsyncadd [#allocation4], 4294967280 }
   0x5   :  { %29 = sfence }
   0x6   :  { %v33_v0 = vld [vmem:[%s580_s2] sm:$0xf]  ;;  %vm45_vm0 = vcmask 1043456   ;;  %v324_v1 = vld [vmem:[%s580_s2 + $0x8] sm:$0xf]  ;;  %vm41_vm1 = vcmask 64512  }
   0x7   :  { %v346_v2 = vld [vmem:[%s579_s1] sm:$0xff]  ;;  %v47_v3 = vsel %vm45_vm0, %v33_v0, 0  ;;  %v113_v4 = vsel %vm45_vm0, %v324_v1, 0  ;;  %v330_v5 = vld [vmem:[%s580_s2 + $0xc] sm:$0xf]  ;;  %v453_v7 = vmov 0.0  }
   0x8   :  { %56 = vmatpush.bf16.msra.mxu0 %v47_v3  ;;  %122 = vmatpush.bf16.msra.mxu2 %v113_v4  ;;  %v146_v6 = vsel %vm45_vm0, %v330_v5, 0  ;;  %197 = vst.msk [vmem:[%s582_s4] sm:$0xff] %vm41_vm1, %v453_v7  ;;  %vm199_vm2 = vcmask 60416   ;;  %v336_v8 = vld [vmem:[%s580_s2 + $0x10] sm:$0xf]  ;;  %v349_v11 = vld [vmem:[%s579_s1 + $0x18] sm:$0xff] }
   0x9   :  { %v348_v9 = vld [vmem:[%s579_s1 + $0x10] sm:$0xff]  ;;  %155 = vmatpush.bf16.msra.mxu3 %v146_v6  ;;  %198 = vst.msk [vmem:[%s582_s4 + $0x8] sm:$0xff] %vm41_vm1, %v453_v7  ;;  %v179_v10 = vsel %vm45_vm0, %v336_v8, 0  ;;  %v318_v12 = vld [vmem:[%s580_s2 + $0x4] sm:$0xf]  ;;  %v347_v14 = vld [vmem:[%s579_s1 + $0x8] sm:$0xff] }
   0xa   :  { %200 = vst.msk [vmem:[%s582_s4 + $0x10] sm:$0xf] %vm199_vm2, %v453_v7  ;;  %v80_v13 = vsel %vm45_vm0, %v318_v12, 0  ;;  %v350_v15 = vld [vmem:[%s579_s1 + $0x20] sm:$0xff]  ;;  %s432_s25 = smov 0  }
   0xb   :  { %317 = vmatmul.msk.bf16.vlgmr.msra.gmra.mxu0 %vm41_vm1, %v346_v2  ;;  %329 = vmatmul.msk.bf16.vlgmr.msra.gmra.mxu2 %vm41_vm1, %v348_v9  ;;  %v393_v16 = vld [vmem:[%s581_s3] ss:$0 sm:$0xff]  ;;  %v394_v19 = vld [vmem:[%s581_s3 + $0x1] ss:$0 sm:$0xff]  ;;  %v395_v20 = vld [vmem:[%s581_s3 + $0x2] ss:$0 sm:$0xff] }
   0xc   :  { %188 = vmatpush.bf16.msrb.mxu0 %v179_v10  ;;  %335 = vmatmul.msk.bf16.vlgmr.msra.gmra.mxu3 %vm41_vm1, %v349_v11  ;;  %v396_v22 = vld [vmem:[%s581_s3 + $0x3] ss:$0 sm:$0xff]  ;;  %v397_v32 = vld [vmem:[%s581_s3 + $0x4] ss:$0 sm:$0xff] }
   0xd   :  { %89 = vmatpush.bf16.msra.mxu1 %v80_v13 }
  0x10   :  { %323 = vmatmul.msk.bf16.vlgmr.msra.gmra.mxu1 %vm41_vm1, %v347_v14 }
  0x1b   :  { %341 = vmatmul.msk.bf16.vlgmr.msrb.gmra.mxu0 %vm41_vm1, %v350_v15 }
  0x88   :  { %v58_v17 = vpop.f32.mrf.mxu0 }
  0x89   :  { %v59_v18 = vadd.f32 %v393_v16, %v58_v17 }
  0x8b   :  { %63 = vst.msk [vmem:[#allocation2] sm:$0xff] %vm41_vm1, %v59_v18 }
  0x8d   :  { %v91_v21 = vpop.f32.mrf.mxu1 }
  0x8e   :  { %v92_v23 = vadd.f32 %v394_v19, %v91_v21  ;;  %v124_v24 = vpop.f32.mrf.mxu2 }
  0x8f   :  { %v125_v25 = vadd.f32 %v395_v20, %v124_v24  ;;  %v157_v26 = vpop.f32.mrf.mxu3 }
  0x90   :  { %96 = vst.msk [vmem:[#allocation2 + $0x10] sm:$0xff] %vm41_vm1, %v92_v23  ;;  %v60_v27 = vpop.f32.mrf.mxu0  ;;  %v158_v28 = vadd.f32 %v396_v22, %v157_v26 }
  0x91   :  { %v61_v29 = vadd.f32 %v393_v16, %v60_v27  ;;  %129 = vst.msk [vmem:[#allocation2 + $0x20] sm:$0xff] %vm41_vm1, %v125_v25 }
  0x92   :  { %162 = vst.msk [vmem:[#allocation2 + $0x30] sm:$0xff] %vm41_vm1, %v158_v28 }
  0x93   :  { %64 = vst.msk [vmem:[#allocation2 + $0x8] sm:$0xff] %vm41_vm1, %v61_v29 }
  0x95   :  { %v93_v30 = vpop.f32.mrf.mxu1 }
  0x96   :  { %v94_v31 = vadd.f32 %v394_v19, %v93_v30  ;;  %v126_v33 = vpop.f32.mrf.mxu2 }
  0x97   :  { %v127_v34 = vadd.f32 %v395_v20, %v126_v33  ;;  %v159_v35 = vpop.f32.mrf.mxu3 }
  0x98   :  { %97 = vst.msk [vmem:[#allocation2 + $0x18] sm:$0xff] %vm41_vm1, %v94_v31  ;;  %v160_v36 = vadd.f32 %v396_v22, %v159_v35  ;;  %v190_v37 = vpop.f32.mrf.mxu0 }
  0x99   :  { %130 = vst.msk [vmem:[#allocation2 + $0x28] sm:$0xff] %vm41_vm1, %v127_v34  ;;  %v191_v38 = vadd.f32 %v397_v32, %v190_v37 }
  0x9a   :  { %163 = vst.msk [vmem:[#allocation2 + $0x38] sm:$0xff] %vm41_vm1, %v160_v36 }
  0x9b   :  { %195 = vst.msk [vmem:[#allocation2 + $0x40] sm:$0xff] %vm41_vm1, %v191_v38 }
  0xa0   :  { %v192_v39 = vpop.f32.mrf.mxu0 }
  0xa1   :  { %v193_v40 = vadd.f32 %v397_v32, %v192_v39 }
  0xa3   :  { %196 = vst.msk [vmem:[#allocation2 + $0x48] sm:$0xff] %vm41_vm1, %v193_v40 }
  0xa4 LB: > { %s207_s3 = sld [smem:[#allocation3 + %s434_s25]]  ;;  %s208_s26 = scalar_lea.vmem [#allocation2], %s434_s25  ;;  %vm211_vm3 = vcmask 57344   ;;  %s434_s25 = sphi %s432_s25, %s206_s25  }
  0xa5   : > { %s206_s25 = sadd.s32 1, %s434_s25  }
  0xa6   : > { %p203_p0 = scmp.ge.s32.totalorder %s206_s25, 4  }
  0xa7   :  { %s436_s30 = smov (%p203_p0), 0  }
  0xa8   :  { %205 = sbr.rel (!%p203_p0) target bundleno = 164 (0xa4), region = 89 }
  0xaa   : > { %v209_v41 = vld [vmem:[%s208_s26] sm:$0x1]  ;;  %s210_s29 = scalar_lea.vmem %s582_s4, %s207_s3 }
  0xab   : > { %212 = vst.msk [vmem:[%s210_s29] sm:$0x1] %vm211_vm3, %v209_v41 }
  0xad LB: > { %s219_s5 = sadd.s32 4, %s438_s30  ;;  %s276_s7 = scalar_lea.vmem [#allocation2], %s438_s30  ;;  %s438_s30 = sphi %s436_s30, %s218_s30  }
  0xae   : > { %s220_s6 = sld [smem:[#allocation3 + %s219_s5]]  ;;  %v342_v42 = vld [vmem:[%s276_s7 + $0x10] sm:$0x1]  ;;  %s218_s30 = sadd.s32 1, %s438_s30  }
  0xaf   : > { %p215_p1 = scmp.ge.s32.totalorder %s218_s30, 4  }
  0xb0   :  { %s440_s11 = smov (%p215_p1), 0  }
  0xb1   :  { %217 = sbr.rel (!%p215_p1) target bundleno = 173 (0xad), region = 100 }
  0xb4   : > { %s224_s10 = scalar_lea.vmem %s582_s4, %s220_s6 }
  0xb5   : > { %226 = vst.msk [vmem:[%s224_s10] sm:$0x1] %vm211_vm3, %v342_v42 }
  0xb6 LB: > { %s233_s12 = sadd.s32 8, %s442_s11  ;;  %s279_s14 = scalar_lea.vmem [#allocation2], %s442_s11  ;;  %s442_s11 = sphi %s440_s11, %s232_s11  }
  0xb7   : > { %s234_s13 = sld [smem:[#allocation3 + %s233_s12]]  ;;  %v343_v43 = vld [vmem:[%s279_s14 + $0x20] sm:$0x1]  ;;  %s232_s11 = sadd.s32 1, %s442_s11  }
  0xb8   : > { %p229_p2 = scmp.ge.s32.totalorder %s232_s11, 4  }
  0xb9   :  { %s444_s17 = smov (%p229_p2), 0  }
  0xba   :  { %231 = sbr.rel (!%p229_p2) target bundleno = 182 (0xb6), region = 111 }
  0xbd   : > { %s238_s16 = scalar_lea.vmem %s582_s4, %s234_s13 }
  0xbe   : > { %240 = vst.msk [vmem:[%s238_s16] sm:$0x1] %vm211_vm3, %v343_v43 }
  0xbf LB: > { %s247_s18 = sadd.s32 12, %s446_s17  ;;  %s282_s20 = scalar_lea.vmem [#allocation2], %s446_s17  ;;  %s446_s17 = sphi %s444_s17, %s246_s17  }
  0xc0   : > { %s248_s19 = sld [smem:[#allocation3 + %s247_s18]]  ;;  %v344_v44 = vld [vmem:[%s282_s20 + $0x30] sm:$0x1]  ;;  %s246_s17 = sadd.s32 1, %s446_s17  }
  0xc1   : > { %p243_p3 = scmp.ge.s32.totalorder %s246_s17, 4  }
  0xc2   :  { %s448_s23 = smov (%p243_p3), 0  }
  0xc3   :  { %245 = sbr.rel (!%p243_p3) target bundleno = 191 (0xbf), region = 122 }
  0xc6   : > { %s252_s1 = scalar_lea.vmem %s582_s4, %s248_s19 }
  0xc7   : > { %254 = vst.msk [vmem:[%s252_s1] sm:$0x1] %vm211_vm3, %v344_v44 }
  0xc8 LB: > { %s261_s24 = sadd.s32 16, %s450_s23  ;;  %s285_s25 = scalar_lea.vmem [#allocation2], %s450_s23  ;;  %s450_s23 = sphi %s448_s23, %s260_s23  }
  0xc9   : > { %s262_s0 = sld [smem:[#allocation3 + %s261_s24]]  ;;  %v345_v45 = vld [vmem:[%s285_s25 + $0x40] sm:$0x1]  ;;  %s260_s23 = sadd.s32 1, %s450_s23  }
  0xca   : > { %p257_p4 = scmp.ge.s32.totalorder %s260_s23, 4  }
  0xcc   :  { %259 = sbr.rel (!%p257_p4) target bundleno = 200 (0xc8), region = 133 }
  0xcf   : > { %s266_s27 = scalar_lea.vmem %s582_s4, %s262_s0 }
  0xd0   : > { %268 = vst.msk [vmem:[%s266_s27] sm:$0x1] %vm211_vm3, %v345_v45 }
  0xd1   :  { %273 = vsyncpa [#allocation4], 1 }

</bundles_post_ra>
